<compile_context>
chip_gen: v7x
topology: tpu7x:2x2x1
jax: 0.10.0
libtpu: 0.0.40
codegen_flags: <defaults>
</compile_context>

<pallas_src>
import functools

import jax
import jax.numpy as jnp
from jax import lax
from jax.experimental import pallas as pl
from jax.experimental.pallas import tpu as pltpu


# ---------------------------------------------------------------------------
# Helpers
# ---------------------------------------------------------------------------

def _vmem_limit():
    """Generation-aware scoped-VMEM budget (bytes)."""
    try:
        cap = pltpu.get_tpu_info().vmem_capacity_bytes
    except Exception:  # pragma: no cover - conservative fallback
        cap = 64 << 20
    return int(min(cap * 3 // 4, 100 << 20))


def _pick_tile(n, target, multiple):
    """Largest divisor of n that is <= target and a multiple of `multiple`.
    Falls back to the full extent (always a legal BlockSpec block dim)."""
    t = min(n, target)
    t -= t % multiple
    while t >= multiple:
        if n % t == 0:
            return t
        t -= multiple
    return n


# ---------------------------------------------------------------------------
# Kernels
# ---------------------------------------------------------------------------

def _linear_kernel(x_ref, w_ref, b_ref, out_ref):
    """y = x @ W + b for one (batch, seq-tile) block (used to hoist the K/V proj)."""
    out_ref[0] = (jnp.dot(x_ref[0], w_ref[...], preferred_element_type=jnp.float32)
                  + b_ref[...]).astype(out_ref.dtype)


def _attn_ln_kernel(*args, num_heads, head_dim, has_bias):
    """LayerNorm(xq + Attn(xq; pre-projected K|V)) with online softmax over kv tiles.

    Grid: (batch, q-tiles, kv-tiles).  The kv axis is a reduction ("arbitrary");
    m/l/acc and the projected Q live in VMEM scratch across kv steps.
    """
    if has_bias:
        (xq_ref, kv_ref, bias_ref, wq_ref, bq_ref, wo_ref, bo_ref,
         gamma_ref, beta_ref, out_ref, q_sc, m_sc, l_sc, acc_sc) = args
    else:
        (xq_ref, kv_ref, wq_ref, bq_ref, wo_ref, bo_ref,
         gamma_ref, beta_ref, out_ref, q_sc, m_sc, l_sc, acc_sc) = args
        bias_ref = None

    ki = pl.program_id(2)
    nk = pl.num_programs(2)
    d = num_heads * head_dim

    # --- init (first kv tile): project Q once per q-tile, zero online-softmax state.
    @pl.when(ki == 0)
    def _init():
        xq = xq_ref[0]                                           # (tq, D)
        # 1/sqrt(head_dim) is already folded into wq/bq by the wrapper.
        q = jnp.dot(xq, wq_ref[...], preferred_element_type=jnp.float32) + bq_ref[...]
        q_sc[...] = q.reshape(q.shape[0], num_heads, head_dim)   # (tq, H, hd)
        m_sc[...] = jnp.full(m_sc.shape, -jnp.inf, jnp.float32)
        l_sc[...] = jnp.zeros(l_sc.shape, jnp.float32)
        acc_sc[...] = jnp.zeros(acc_sc.shape, jnp.float32)

    # --- one kv tile of online-softmax attention (heads batched in one einsum).
    kv = kv_ref[0]                                               # (tk, 2D) pre-projected
    tk = kv.shape[0]
    k3 = kv[:, :d].reshape(tk, num_heads, head_dim)              # (tk, H, hd)
    v3 = kv[:, d:].reshape(tk, num_heads, head_dim)
    q3 = q_sc[...]                                               # (tq, H, hd)

    s = jnp.einsum("qhd,khd->hqk", q3, k3,
                   preferred_element_type=jnp.float32)           # (H, tq, tk)
    if has_bias:
        s = s + bias_ref[...][None, :, :]                        # additive mask bias

    m_prev = m_sc[...]                                           # (H, tq, 1)
    m_new = jnp.maximum(m_prev, jnp.max(s, axis=-1, keepdims=True))
    alpha = jnp.exp(m_prev - m_new)
    p = jnp.exp(s - m_new)
    l_sc[...] = alpha * l_sc[...] + jnp.sum(p, axis=-1, keepdims=True)
    acc_sc[...] = alpha * acc_sc[...] + jnp.einsum(
        "hqk,khd->hqd", p.astype(v3.dtype), v3,
        preferred_element_type=jnp.float32)                      # (H, tq, hd)
    m_sc[...] = m_new

    # --- finalize (last kv tile): normalize, output projection, residual + LN.
    @pl.when(ki == nk - 1)
    def _fin():
        ctx = acc_sc[...] * pl.reciprocal(l_sc[...], approx=True)   # (H, tq, hd)
        attn = jnp.swapaxes(ctx, 0, 1).reshape(-1, d)                # (tq, D)
        y = jnp.dot(attn.astype(wo_ref.dtype), wo_ref[...],
                    preferred_element_type=jnp.float32) + bo_ref[...]
        h = xq_ref[0].astype(jnp.float32) + y                        # residual add
        mean = jnp.mean(h, axis=-1, keepdims=True)
        var = jnp.mean((h - mean) ** 2, axis=-1, keepdims=True)
        normed = (h - mean) * lax.rsqrt(var + 1e-5)
        out_ref[0] = (normed * gamma_ref[...] + beta_ref[...]).astype(out_ref.dtype)


def _ffn_ln_kernel(x_ref, w1_ref, b1_ref, w2_ref, b2_ref,
                   gamma_ref, beta_ref, out_ref, acc_sc):
    """LayerNorm(x + relu(x @ W1 + b1) @ W2 + b2), d_ff tiled along grid axis 2."""
    fi = pl.program_id(2)
    nf = pl.num_programs(2)
    x = x_ref[0]                                                 # (ts, D)

    @pl.when(fi == 0)
    def _init():
        acc_sc[...] = jnp.zeros(acc_sc.shape, jnp.float32)

    h = jnp.dot(x, w1_ref[...], preferred_element_type=jnp.float32) + b1_ref[...]
    h = jnp.maximum(h, 0.0)                                      # ReLU per d_ff chunk
    acc_sc[...] += jnp.dot(h.astype(w2_ref.dtype), w2_ref[...],
                           preferred_element_type=jnp.float32)

    @pl.when(fi == nf - 1)
    def _fin():
        z = x.astype(jnp.float32) + acc_sc[...] + b2_ref[...]
        mean = jnp.mean(z, axis=-1, keepdims=True)
        var = jnp.mean((z - mean) ** 2, axis=-1, keepdims=True)
        normed = (z - mean) * lax.rsqrt(var + 1e-5)
        out_ref[0] = (normed * gamma_ref[...] + beta_ref[...]).astype(out_ref.dtype)


# ---------------------------------------------------------------------------
# pallas_call wrappers
# ---------------------------------------------------------------------------

def kv_projection(xkv, wkv, bkv, *, s_tile=256):
    """Hoisted K|V projection: (B, Sk, D) @ (D, 2D) + b, computed once per sequence."""
    B, Sk, D = xkv.shape
    Dout = wkv.shape[1]
    ts = _pick_tile(Sk, s_tile, 8)
    return pl.pallas_call(
        _linear_kernel,
        out_shape=jax.ShapeDtypeStruct((B, Sk, Dout), xkv.dtype),
        grid=(B, Sk // ts),
        in_specs=[
            pl.BlockSpec((1, ts, D), lambda b, si: (b, si, 0)),
            pl.BlockSpec((D, Dout), lambda b, si: (0, 0)),
            pl.BlockSpec((1, Dout), lambda b, si: (0, 0)),
        ],
        out_specs=pl.BlockSpec((1, ts, Dout), lambda b, si: (b, si, 0)),
        compiler_params=pltpu.CompilerParams(
            dimension_semantics=("parallel", "parallel"),
            vmem_limit_bytes=_vmem_limit()),
    )(xkv, wkv, bkv)


def mha_add_layernorm(xq, kv, attn_bias, wq, bq, wo, bo, gamma, beta, num_heads,
                      *, q_tile=256, k_tile=512):
    """LayerNorm(xq + MHA(xq, pre-projected kv)); attn_bias may be None (no mask)."""
    B, Sq, D = xq.shape
    Sk = kv.shape[1]
    head_dim = D // num_heads
    tq = _pick_tile(Sq, q_tile, 8)
    tk = _pick_tile(Sk, k_tile, 128)
    has_bias = attn_bias is not None

    kernel = functools.partial(_attn_ln_kernel, num_heads=num_heads,
                               head_dim=head_dim, has_bias=has_bias)

    in_specs = [
        pl.BlockSpec((1, tq, D), lambda b, qi, ki: (b, qi, 0)),      # xq (+ residual)
        pl.BlockSpec((1, tk, 2 * D), lambda b, qi, ki: (b, ki, 0)),  # projected K|V
    ]
    operands = [xq, kv]
    if has_bias:
        in_specs.append(pl.BlockSpec((tq, tk), lambda b, qi, ki: (qi, ki)))
        operands.append(attn_bias)
    in_specs += [
        pl.BlockSpec((D, D), lambda b, qi, ki: (0, 0)),              # wq (scale folded)
        pl.BlockSpec((1, D), lambda b, qi, ki: (0, 0)),              # bq (scale folded)
        pl.BlockSpec((D, D), lambda b, qi, ki: (0, 0)),              # wo
        pl.BlockSpec((1, D), lambda b, qi, ki: (0, 0)),              # bo
        pl.BlockSpec((1, D), lambda b, qi, ki: (0, 0)),              # gamma
        pl.BlockSpec((1, D), lambda b, qi, ki: (0, 0)),              # beta
    ]
    operands += [wq, bq, wo, bo, gamma, beta]

    return pl.pallas_call(
        kernel,
        out_shape=jax.ShapeDtypeStruct((B, Sq, D), xq.dtype),
        grid=(B, Sq // tq, Sk // tk),
        in_specs=in_specs,
        out_specs=pl.BlockSpec((1, tq, D), lambda b, qi, ki: (b, qi, 0)),
        scratch_shapes=[
            pltpu.VMEM((tq, num_heads, head_dim), jnp.float32),      # projected Q
            pltpu.VMEM((num_heads, tq, 1), jnp.float32),             # running max m
            pltpu.VMEM((num_heads, tq, 1), jnp.float32),             # running sum l
            pltpu.VMEM((num_heads, tq, head_dim), jnp.float32),      # acc
        ],
        compiler_params=pltpu.CompilerParams(
            dimension_semantics=("parallel", "parallel", "arbitrary"),
            vmem_limit_bytes=_vmem_limit()),
    )(*operands)


def ffn_add_layernorm(x, w1, b1, w2, b2, gamma, beta, *, s_tile=256, ff_tile=512):
    B, S, D = x.shape
    Dff = w1.shape[1]
    ts = _pick_tile(S, s_tile, 8)
    tff = _pick_tile(Dff, ff_tile, 128)
    return pl.pallas_call(
        _ffn_ln_kernel,
        out_shape=jax.ShapeDtypeStruct((B, S, D), x.dtype),
        grid=(B, S // ts, Dff // tff),
        in_specs=[
            pl.BlockSpec((1, ts, D), lambda b, si, fi: (b, si, 0)),  # x (+ residual)
            pl.BlockSpec((D, tff), lambda b, si, fi: (0, fi)),       # W1 chunk
            pl.BlockSpec((1, tff), lambda b, si, fi: (0, fi)),       # b1 chunk
            pl.BlockSpec((tff, D), lambda b, si, fi: (fi, 0)),       # W2 chunk
            pl.BlockSpec((1, D), lambda b, si, fi: (0, 0)),          # b2
            pl.BlockSpec((1, D), lambda b, si, fi: (0, 0)),          # gamma
            pl.BlockSpec((1, D), lambda b, si, fi: (0, 0)),          # beta
        ],
        out_specs=pl.BlockSpec((1, ts, D), lambda b, si, fi: (b, si, 0)),
        scratch_shapes=[pltpu.VMEM((ts, D), jnp.float32)],
        compiler_params=pltpu.CompilerParams(
            dimension_semantics=("parallel", "parallel", "arbitrary"),
            vmem_limit_bytes=_vmem_limit()),
    )(x, w1, b1, w2, b2, gamma, beta)


# ---------------------------------------------------------------------------
# TransformerDecoderLayer forward (weight packing / mask bias in plain JAX)
# ---------------------------------------------------------------------------

def _prep_attn(attn_params, head_dim):
    """Fold 1/sqrt(head_dim) into Wq/bq and pack K|V weights into one (D, 2D) block."""
    wq, bq, wk, bk, wv, bv, wo, bo = attn_params
    scale = 1.0 / float(head_dim) ** 0.5
    wkv = jnp.concatenate([wk, wv], axis=1)          # (D, 2D)
    bkv = jnp.concatenate([bk, bv], axis=1)          # (1, 2D)
    return wq * scale, bq * scale, wkv, bkv, wo, bo


def _mask_to_bias(mask):
    return jnp.where(mask == 0.0, jnp.float32(-1e9), jnp.float32(0.0))


def transformer_decoder_layer(x, encoder_output, src_mask, tgt_mask, params, num_heads):
    D = x.shape[-1]
    head_dim = D // num_heads
    tgt_bias = None if tgt_mask is None else _mask_to_bias(tgt_mask)
    src_bias = None if src_mask is None else _mask_to_bias(src_mask)

    wq1, bq1, wkv1, bkv1, wo1, bo1 = _prep_attn(params["self_attn"], head_dim)
    wq2, bq2, wkv2, bkv2, wo2, bo2 = _prep_attn(params["cross_attn"], head_dim)

    # Hoisted K/V projections: once per sequence, not once per q-tile.
    kv_cross = kv_projection(encoder_output, wkv2, bkv2)
    kv_self = kv_projection(x, wkv1, bkv1)

    # self-attention + fused add&norm
    x = mha_add_layernorm(x, kv_self, tgt_bias, wq1, bq1, wo1, bo1,
                          *params["norm1"], num_heads)
    # cross-attention + fused add&norm (src_mask=None -> no bias DMA / add at all)
    x = mha_add_layernorm(x, kv_cross, src_bias, wq2, bq2, wo2, bo2,
                          *params["norm2"], num_heads)
    # feed-forward + fused add&norm
    x = ffn_add_layernorm(x, *params["ffn"], *params["norm3"])
    return x


# ---------------------------------------------------------------------------
# Pure-JAX reference (for correctness check)
# ---------------------------------------------------------------------------

def _ref_mha(xq, xkv, mask, params, num_heads):
    wq, bq, wk, bk, wv, bv, wo, bo = params
    B, Sq, D = xq.shape
    Sk = xkv.shape[1]
    hd = D // num_heads
    q = (xq @ wq + bq).reshape(B, Sq, num_heads, hd).transpose(0, 2, 1, 3)
    k = (xkv @ wk + bk).reshape(B, Sk, num_heads, hd).transpose(0, 2, 1, 3)
    v = (xkv @ wv + bv).reshape(B, Sk, num_heads, hd).transpose(0, 2, 1, 3)
    scores = jnp.einsum("bhqd,bhkd->bhqk", q, k) / jnp.sqrt(jnp.float32(hd))
    if mask is not None:
        scores = jnp.where(mask[None, None] == 0.0, -1e9, scores)
    p = jax.nn.softmax(scores, axis=-1)
    o = jnp.einsum("bhqk,bhkd->bhqd", p, v).transpose(0, 2, 1, 3).reshape(B, Sq, D)
    return o @ wo + bo


def _ref_ln(x, gamma, beta):
    m = jnp.mean(x, axis=-1, keepdims=True)
    v = jnp.mean((x - m) ** 2, axis=-1, keepdims=True)
    return (x - m) / jnp.sqrt(v + 1e-5) * gamma + beta


def _ref_decoder_layer(x, enc, src_mask, tgt_mask, params, num_heads):
    x = _ref_ln(x + _ref_mha(x, x, tgt_mask, params["self_attn"], num_heads),
                *params["norm1"])
    x = _ref_ln(x + _ref_mha(x, enc, src_mask, params["cross_attn"], num_heads),
                *params["norm2"])
    w1, b1, w2, b2 = params["ffn"]
    ff = jnp.maximum(x @ w1 + b1, 0.0) @ w2 + b2
    x = _ref_ln(x + ff, *params["norm3"])
    return x


# ---------------------------------------------------------------------------
# Deterministic parameter init + demo
# ---------------------------------------------------------------------------

def init_params(key, d_model, d_ff):
    keys = jax.random.split(key, 12)

    def lin(k, din, dout):
        w = jax.random.normal(k, (din, dout), jnp.float32) * 0.02
        b = jnp.zeros((1, dout), jnp.float32)
        return w, b

    def mha_params(ks):
        wq, bq = lin(ks[0], d_model, d_model)
        wk, bk = lin(ks[1], d_model, d_model)
        wv, bv = lin(ks[2], d_model, d_model)
        wo, bo = lin(ks[3], d_model, d_model)
        return (wq, bq, wk, bk, wv, bv, wo, bo)

    params = {
        "self_attn": mha_params(keys[0:4]),
        "cross_attn": mha_params(keys[4:8]),
        "ffn": lin(keys[8], d_model, d_ff) + lin(keys[9], d_ff, d_model),
        "norm1": (jnp.ones((1, d_model), jnp.float32), jnp.zeros((1, d_model), jnp.float32)),
        "norm2": (jnp.ones((1, d_model), jnp.float32), jnp.zeros((1, d_model), jnp.float32)),
        "norm3": (jnp.ones((1, d_model), jnp.float32), jnp.zeros((1, d_model), jnp.float32)),
    }
    return params


if __name__ == "__main__":
    B, S, S_ENC = 2, 8, 8
    D_MODEL, NUM_HEADS, D_FF = 128, 4, 256

    key = jax.random.PRNGKey(0)
    kx, kenc, kp = jax.random.split(key, 3)
    x = jax.random.normal(kx, (B, S, D_MODEL), jnp.float32)
    encoder_output = jax.random.normal(kenc, (B, S_ENC, D_MODEL), jnp.float32)
    params = init_params(kp, D_MODEL, D_FF)

    # tgt_mask: causal; src_mask: None (PyTorch mask=None -> no masking, no bias DMA)
    tgt_mask = jnp.tril(jnp.ones((S, S), jnp.float32))
    src_mask = None

    out = transformer_decoder_layer(x, encoder_output, src_mask, tgt_mask,
                                    params, NUM_HEADS)
    out = jax.block_until_ready(out)

    ref = _ref_decoder_layer(x, encoder_output, src_mask, tgt_mask, params, NUM_HEADS)
    assert out.shape == (B, S, D_MODEL)
    assert jnp.allclose(out, ref, atol=2e-3, rtol=2e-3), "Pallas output mismatch vs reference"

    print("KERNEL_OK")
</pallas_src>

<mosaic_0001>
module attributes {stable_mosaic.version = 11 : i64} {
  func.func @_linear_kernel(%arg0: i32, %arg1: i32, %arg2: memref<1x8x128xf32, #tpu.memory_space<vmem>>, %arg3: memref<128x256xf32, #tpu.memory_space<vmem>>, %arg4: memref<1x256xf32, #tpu.memory_space<vmem>>, %arg5: memref<1x8x256xf32, #tpu.memory_space<vmem>>) attributes {dimension_semantics = [#tpu.dimension_semantics<parallel>, #tpu.dimension_semantics<parallel>], iteration_bounds = array<i64: 2, 1>, scalar_prefetch = 0 : i64, scratch_operands = 0 : i64, tpu.core_type = #tpu.core_type<tc>, window_params = [{transform_indices = @transform_0, window_bounds = array<i64: 1, 8, 128>}, {pipeline_mode = #tpu.pipeline_mode<synchronous>, transform_indices = @transform_1, window_bounds = array<i64: 128, 256>}, {pipeline_mode = #tpu.pipeline_mode<synchronous>, transform_indices = @transform_2, window_bounds = array<i64: 1, 256>}, {transform_indices = @transform_3, window_bounds = array<i64: 1, 8, 256>}]} {
    %c0 = arith.constant 0 : index
    %c0_0 = arith.constant 0 : index
    %c0_1 = arith.constant 0 : index
    %0 = vector.load %arg2[%c0, %c0_0, %c0_1] : memref<1x8x128xf32, #tpu.memory_space<vmem>>, vector<1x8x128xf32>
    %1 = vector.shape_cast %0 : vector<1x8x128xf32> to vector<8x128xf32>
    %c0_2 = arith.constant 0 : index
    %c0_3 = arith.constant 0 : index
    %2 = vector.load %arg3[%c0_2, %c0_3] : memref<128x256xf32, #tpu.memory_space<vmem>>, vector<128x256xf32>
    %cst = arith.constant dense<0.000000e+00> : vector<8x256xf32>
    %3 = tpu.matmul %1, %2, %cst {dimension_numbers = #tpu.dot_dimension_numbers<[1], [0], [0], [1], [0, 0, 1, 1], [], []>} : vector<8x128xf32>, vector<128x256xf32>, vector<8x256xf32> -> vector<8x256xf32>
    %c0_4 = arith.constant 0 : index
    %c0_5 = arith.constant 0 : index
    %4 = vector.load %arg4[%c0_4, %c0_5] : memref<1x256xf32, #tpu.memory_space<vmem>>, vector<1x256xf32>
    %5 = vector.broadcast %4 : vector<1x256xf32> to vector<8x256xf32>
    %6 = arith.addf %3, %5 : vector<8x256xf32>
    %c0_6 = arith.constant 0 : index
    %c0_7 = arith.constant 0 : index
    %c0_8 = arith.constant 0 : index
    %7 = vector.load %arg5[%c0_6, %c0_7, %c0_8] : memref<1x8x256xf32, #tpu.memory_space<vmem>>, vector<1x8x256xf32>
    %8 = vector.shape_cast %7 : vector<1x8x256xf32> to vector<8x256xf32>
    %9 = vector.shape_cast %6 : vector<8x256xf32> to vector<1x8x256xf32>
    tpu.vector_store %arg5[%c0_6, %c0_7, %c0_8], %9 {strides = array<i32>} : memref<1x8x256xf32, #tpu.memory_space<vmem>>, vector<1x8x256xf32>,
    return
  }
  func.func @transform_0(%arg0: i32, %arg1: i32) -> (i32, i32, i32) {
    %c0_i32 = arith.constant 0 : i32
    %c0_i32_0 = arith.constant 0 : i32
    return %arg0, %arg1, %c0_i32 : i32, i32, i32
  }
  func.func @transform_1(%arg0: i32, %arg1: i32) -> (i32, i32) {
    %c0_i32 = arith.constant 0 : i32
    %c0_i32_0 = arith.constant 0 : i32
    %c0_i32_1 = arith.constant 0 : i32
    return %c0_i32, %c0_i32_0 : i32, i32
  }
  func.func @transform_2(%arg0: i32, %arg1: i32) -> (i32, i32) {
    %c0_i32 = arith.constant 0 : i32
    %c0_i32_0 = arith.constant 0 : i32
    %c0_i32_1 = arith.constant 0 : i32
    return %c0_i32, %c0_i32_0 : i32, i32
  }
  func.func @transform_3(%arg0: i32, %arg1: i32) -> (i32, i32, i32) {
    %c0_i32 = arith.constant 0 : i32
    %c0_i32_0 = arith.constant 0 : i32
    return %arg0, %arg1, %c0_i32 : i32, i32, i32
  }
}

</mosaic_0001>

<bundles_post_ra>
// kernel: tpu_custom_call.1
= control target key start
LH: loop header
LB: loop body
LE: loop exit
PB: predicated region body
PF: predicated region fallthrough
CT: control target
= control target key end

     0   :  { %8 = vsyncpa [#allocation3], 0  ;;  %s963_s0 = inlined_call_operand.hbm [shape: f32[2,8,128], index: 0, kind: input, shape index: {}]   ;;  %s964_s1 = inlined_call_operand.hbm [shape: f32[128,256], index: 1, kind: input, shape index: {}]   ;;  %s965_s2 = inlined_call_operand.vmem [shape: f32[1,256], index: 2, kind: input, shape index: {}]   ;;  %s966_s3 = inlined_call_operand.hbm [shape: f32[2,8,256], index: 3, kind: output, shape index: {}]  }
   0x1   :  { %10 = vsyncpa [#allocation3 + $0x1], 0 }
   0x2   :  { %11 = vsyncpa [#allocation6], 0 }
   0x3   :  { %12 = vsyncpa [#allocation4], 0 }
   0x4   :  { %14 = vsyncpa [#allocation4 + $0x1], 0  ;;  %s742_s12 = smov 0   ;;  %s744_s13 = smov 0  }
   0x5   :  { %s746_s14 = smov 0   ;;  %s748_s15 = smov 0  }
   0x6   :  { %s750_s16 = smov 0   ;;  %s752_s17 = smov 0  }
   0x7 LB: > { %s445_s18 = sadd.s32 4294967295, %s714_s17   ;;  %s446_s19 = sadd.s32 4294967294, %s714_s17   ;;  %s714_s17 = sphi %s752_s17, %s20_s17   ;;  %s710_s16 = sphi %s750_s16, %s990_s16   ;;  %s706_s15 = sphi %s748_s15, %s989_s15   ;;  %s702_s14 = sphi %s746_s14, %s988_s14   ;;  %s698_s13 = sphi %s744_s13, %s987_s13   ;;  %s694_s12 = sphi %s742_s12, %s986_s12  }
   0x8   : > { %p54_p0 = scmp.ne.s32.totalorder %s698_s13, %s694_s12  ;;  %p776_p1 = scmp.eq.s32.totalorder %s445_s18, 0 }
   0x9   : > { %p780_p2 = scmp.eq.s32.totalorder %s445_s18, 1  ;;  %p128_p3 = scmp.eq.s32.totalorder %s446_s19, 1 }
   0xa   : > { %s971_s20 = scalar_select %p776_p1, 1, 0 }
   0xb   : > { %s972_s21 = scalar_select %p780_p2, 1, 0 }
   0xc   : > { %p786_p4 = por %p776_p1, %p54_p0  ;;  %p447_p5 = scmp.ge.s32.totalorder %s714_s17, 1 }
   0xd   : > { %p791_p6 = por %p128_p3, %p54_p0  ;;  %p135_p7 = scmp.lt.s32.totalorder %s714_s17, 3 }
   0xe   : > { %s973_s22 = scalar_select %p786_p4, 1, 0 }
   0xf   : > { %s974_s23 = scalar_select %p791_p6, 1, 0 }
  0x10   : > { %p796_p8 = pnand %p447_p5, %p135_p7  ;;  %s716_s25 = smov [#allocation5]  }
  0x11   : > { %s147_s26 = sshll.u32 %s716_s25, 4  ;;  %s32_s28 = sadd.s32 1, %s710_s16  ;;  %s148_s26 = int_to_ptr.vmem [resolvable:$true] %s147_s26 }
  0x12   : > { %s975_s24 = scalar_select %p796_p8, 1, 0 }
  0x13   : > { %p502_p9 = pneg %p796_p8  ;;  %s570_s4 = scalar_lea.hbm %s964_s1, 4096 }
  0x14   : > { %p571_p12 = scmp.ne.s32.totalorder %s964_s1, %s570_s4  ;;  %p577_p5 = scmp.lt.u32.totalorder %s570_s4, %s964_s1 }
  0x15   : > { %p805_p11 = pnand %p502_p9, %p776_p1 }
  0x17   : > { %p572_p13 = pneg %p805_p11 }
  0x19   : > { %p573_p0 = pnand %p572_p13, %p571_p12 }
  0x1b   : > { %p574_p3 = pneg %p573_p0 }
  0x1d   : > { %p579_p7 = pnand %p577_p5, %p574_p3 }
  0x1f   : > { %582 = shalt.err (!%p579_p7)
}
  0x20   : > { %s583_s9 = scalar_lea.vmem %s148_s26, 4096  ;;  %p591_p1 = scmp.lt.s32.totalorder %s148_s26, %s148_s26 }
  0x21   : > { %p584_p9 = scmp.ne.s32.totalorder %s148_s26, %s583_s9  ;;  %p592_p4 = scmp.lt.s32.totalorder %s583_s9, %s583_s9 }
  0x23   : > { %p586_p10 = pnand %p584_p9, %p572_p13  ;;  %p593_p8 = por %p592_p4, %p591_p1 }
  0x25   : > { %p587_p6 = pneg %p586_p10 }
  0x27   : > { %p594_p2 = pnand %p593_p8, %p587_p6 }
  0x29   : > { %597 = shalt.err (!%p594_p2)
}
  0x2a   : > { %s717_s10 = smov 256   ;;  %s718_s11 = smov 16  }
  0x2b   : > { %505 = dma.hbm_to_vmem [thread:$0]  (!%p805_p11), %s964_s1, 4096, %s148_s26, [#allocation6], %s717_s10, %s717_s10, %s718_s11  }
  0x2c   : > { %p34_p1 = scmp.ge.s32.totalorder %s32_s28, 2  ;;  %s41_s25 = sadd.s32 1, %s702_s14 }
  0x2d   : > { %p48_p2 = scmp.ne.s32.totalorder %s702_s14, %s698_s13  ;;  %p49_p4 = scmp.eq.s32.totalorder %s714_s17, 0 }
  0x2e   : > { %s992_s28 = smov (%p34_p1, %s32_s28), 0  ;;  %p978_p8 = scmp.ne.s32.totalorder %s972_s21, 0 }
  0x2f   : > { %p832_p6 = por %p49_p4, %p48_p2  ;;  %s36_s27 = ssub.s32 %s710_s16, %s992_s28 }
  0x30   : > { %p838_p10 = por %p978_p8, %p48_p2  ;;  %p515_p12 = scmp.lt.s32.totalorder %s714_s17, 2 }
  0x31   : > { %p39_p11 = scmp.eq.s32.totalorder %s36_s27, 0  ;;  %s164_s26 = sand.u32 1, %s702_s14  }
  0x32   : > { %s450_s4 = sshll.u32 %s164_s26, 3  ;;  %s451_s6 = sshll.u32 %s710_s16, 7 }
  0x33   : > { %s847_s5 = scalar_select %p39_p11, %s702_s14, %s41_s25  }
  0x34   : > { %s853_s9 = scalar_lea.hbm %s963_s0, %s451_s6  ;;  %s168_s21 = scalar_lea.vmem [#allocation2], %s450_s4 }
  0x35   : > { %s176_s10 = sshll.u32 %s168_s21, 4  ;;  %p859_p13 = pnand %p515_p12, %p832_p6  ;;  %s855_s10 = int_to_ptr.vmem [resolvable:$true] %s176_s10 }
  0x36   : > { %s165_s18 = scalar_lea.sflag [#allocation3], %s164_s26  ;;  %s598_s19 = scalar_lea.hbm %s853_s9, 128 }
  0x37   : > { %p599_p0 = scmp.ne.s32.totalorder %s853_s9, %s598_s19  ;;  %p600_p3 = pneg %p859_p13 }
  0x38   : > { %s603_s4 = scalar_lea.hbm %s963_s0, 256  ;;  %p604_p9 = scmp.lt.u32.totalorder %s853_s9, %s963_s0 }
  0x39   : > { %p601_p5 = pnand %p600_p3, %p599_p0  ;;  %p605_p1 = scmp.lt.u32.totalorder %s603_s4, %s598_s19 }
  0x3a   : > { %p607_p4 = scmp.lt.u32.totalorder %s598_s19, %s853_s9 }
  0x3b   : > { %p602_p7 = pneg %p601_p5  ;;  %p606_p2 = por %p605_p1, %p604_p9 }
  0x3d   : > { %p608_p6 = por %p607_p4, %p606_p2 }
  0x3f   : > { %p609_p8 = pnand %p608_p6, %p602_p7 }
  0x41   : > { %612 = shalt.err (!%p609_p8)
}
  0x42   : > { %s613_s26 = scalar_lea.vmem %s855_s10, 128  ;;  %s719_s7 = smov [#allocation2]  }
  0x43   : > { %p614_p12 = scmp.ne.s32.totalorder %s855_s10, %s613_s26  ;;  %s618_s8 = sshll.u32 %s719_s7, 4  ;;  %s619_s8 = int_to_ptr.vmem [resolvable:$false] %s618_s8 }
  0x44   : > { %s620_s21 = scalar_lea.vmem %s619_s8, 256  ;;  %p621_p5 = scmp.lt.s32.totalorder %s855_s10, %s619_s8 }
  0x45   : > { %p616_p11 = pnand %p614_p12, %p600_p3  ;;  %p622_p9 = scmp.lt.s32.totalorder %s620_s21, %s613_s26 }
  0x47   : > { %p617_p0 = pneg %p616_p11  ;;  %p623_p1 = por %p622_p9, %p621_p5 }
  0x49   : > { %p624_p2 = pnand %p623_p1, %p617_p0 }
  0x4b   : > { %627 = shalt.err (!%p624_p2)
}
  0x4c   : > { %509 = dma.hbm_to_vmem [thread:$0]  (!%p859_p13), %s853_s9, 128, %s855_s10, %s165_s18  }
  0x4d   : > { %p981_p7 = scmp.ne.s32.totalorder %s975_s24, 0 }
  0x4e   : > { %s891_s19 = sand.u32 (!%p981_p7), 1, %s698_s13   ;;  %p982_p3 = scmp.ne.s32.totalorder (!%p981_p7), %s973_s22, 0 }
  0x4f   : > { %185 = sbr.rel (%p981_p7) target bundleno = 354 (0x162), region = 32  ;;  %s453_s25 = sshll.u32 (!%p981_p7), %s891_s19, 3 }
  0x50   : > { %s188_s27 = scalar_lea.sflag (!%p981_p7), [#allocation3], %s891_s19  ;;  %s895_s4 = scalar_lea.vmem (!%p981_p7), [#allocation2], %s453_s25 }
  0x56   : > { %681 = dma.done.wait (%p982_p3), %s188_s27, 128  }
  0x57   : > { %683 = vsyncadd (%p982_p3), %s188_s27, 4294967168  ;;  %p983_p13 = scmp.ne.s32.totalorder %s971_s20, 0 }
  0x59   : > { %685 = dma.done.wait (%p983_p13), [#allocation6], 4096  }
  0x5a   : > { %687 = vsyncadd (%p983_p13), [#allocation6], 4294963200  ;;  %v720_v0 = vmov 0.0   ;;  %v220_v1 = vld [vmem:[#allocation5 + $0x8] sm:$0xff]  ;;  %v222_v2 = vld [vmem:[#allocation5 + $0x18] sm:$0xff]  ;;  %v253_v50 = vlaneseq  ;;  %s455_s20 = sshll.u32 %s891_s19, 4 }
  0x5b   : > { %327 = vmatprep.mubr.f32.mxu0 %v720_v0  ;;  %v219_v3 = vld [vmem:[#allocation5] sm:$0xff]  ;;  %v462_v4 = vpack.c.bf16 %v222_v2, %v220_v1  ;;  %v221_v5 = vld [vmem:[#allocation5 + $0x10] sm:$0xff]  ;;  %v224_v6 = vld [vmem:[#allocation5 + $0x28] sm:$0xff]  ;;  %s461_s9 = sshll.u32 %s706_s15, 8  ;;  %s217_s10 = scalar_lea.vmem [#allocation7], %s455_s20 }
  0x5c   : > { %v226_v7 = vld [vmem:[#allocation5 + $0x38] sm:$0xff]  ;;  %v464_v8 = vpack.c.bf16 %v221_v5, %v219_v3  ;;  %v223_v10 = vld [vmem:[#allocation5 + $0x20] sm:$0xff]  ;;  %v225_v11 = vld [vmem:[#allocation5 + $0x30] sm:$0xff]  ;;  %v254_v51 = vshrl.u32 %v253_v50, 7  ;;  %s353_s11 = sshll.u32 %s217_s10, 4  ;;  %s914_s6 = scalar_lea.hbm %s966_s3, %s461_s9  ;;  %s916_s11 = int_to_ptr.vmem [resolvable:$true] %s353_s11 }
  0x5d   : > { %v466_v9 = vpack.c.bf16 %v226_v7, %v224_v6  ;;  %v228_v12 = vld [vmem:[#allocation5 + $0x48] sm:$0xff]  ;;  %463 = vmatprep.subr.bf16.mxu0 %v462_v4  ;;  %v230_v13 = vld [vmem:[#allocation5 + $0x58] sm:$0xff]  ;;  %v468_v14 = vpack.c.bf16 %v225_v11, %v223_v10  ;;  %v227_v16 = vld [vmem:[#allocation5 + $0x40] sm:$0xff]  ;;  %s337_s26 = scalar_lea.sflag [#allocation4], %s891_s19  ;;  %s628_s15 = scalar_lea.vmem %s916_s11, 256 }
  0x5e   : > { %465 = vmatpush1.bf16.msra.mxu0 %v464_v8  ;;  %v470_v15 = vpack.c.bf16 %v230_v13, %v228_v12  ;;  %v229_v17 = vld [vmem:[#allocation5 + $0x50] sm:$0xff]  ;;  %v232_v18 = vld [vmem:[#allocation5 + $0x68] sm:$0xff]  ;;  %v234_v19 = vld [vmem:[#allocation5 + $0x78] sm:$0xff]  ;;  %v255_v52 = vsub.s32 0, %v254_v51  ;;  %v259_v54 = vsub.s32 1, %v254_v51  ;;  %p629_p4 = scmp.ne.s32.totalorder %s916_s11, %s628_s15  ;;  %s721_s7 = smov [#allocation7]  }
  0x5f   : > { %467 = vmatprep.subr.bf16.mxu0 %v466_v9  ;;  %v472_v20 = vpack.c.bf16 %v229_v17, %v227_v16  ;;  %v474_v21 = vpack.c.bf16 %v234_v19, %v232_v18  ;;  %v231_v22 = vld [vmem:[#allocation5 + $0x60] sm:$0xff]  ;;  %v233_v23 = vld [vmem:[#allocation5 + $0x70] sm:$0xff]  ;;  %v236_v24 = vld [vmem:[#allocation5 + $0x88] sm:$0xff]  ;;  %s632_s8 = sshll.u32 %s721_s7, 4  ;;  %s633_s8 = int_to_ptr.vmem [resolvable:$false] %s632_s8 }
  0x60   : > { %v238_v25 = vld [vmem:[#allocation5 + $0x98] sm:$0xff]  ;;  %v476_v26 = vpack.c.bf16 %v233_v23, %v231_v22  ;;  %v235_v28 = vld [vmem:[#allocation5 + $0x80] sm:$0xff]  ;;  %v237_v29 = vld [vmem:[#allocation5 + $0x90] sm:$0xff]  ;;  %p630_p6 = pnand %p629_p4, %p838_p10  ;;  %s634_s21 = scalar_lea.vmem %s633_s8, 512 }
  0x61   : > { %v478_v27 = vpack.c.bf16 %v238_v25, %v236_v24  ;;  %v240_v30 = vld [vmem:[#allocation5 + $0xa8] sm:$0xff]  ;;  %v242_v31 = vld [vmem:[#allocation5 + $0xb8] sm:$0xff]  ;;  %v480_v32 = vpack.c.bf16 %v237_v29, %v235_v28  ;;  %v239_v34 = vld [vmem:[#allocation5 + $0xa0] sm:$0xff]  ;;  %p635_p12 = scmp.lt.s32.totalorder %s916_s11, %s633_s8  ;;  %p636_p11 = scmp.lt.s32.totalorder %s634_s21, %s628_s15 }
  0x62   : > { %469 = vmatpush1.bf16.msra.mxu0 %v468_v14  ;;  %v482_v33 = vpack.c.bf16 %v242_v31, %v240_v30  ;;  %v241_v35 = vld [vmem:[#allocation5 + $0xb0] sm:$0xff]  ;;  %v244_v36 = vld [vmem:[#allocation5 + $0xc8] sm:$0xff]  ;;  %v246_v37 = vld [vmem:[#allocation5 + $0xd8] sm:$0xff]  ;;  %p631_p8 = pneg %p630_p6 }
  0x63   : > { %471 = vmatprep.subr.bf16.mxu0 %v470_v15  ;;  %v484_v38 = vpack.c.bf16 %v241_v35, %v239_v34  ;;  %v486_v39 = vpack.c.bf16 %v246_v37, %v244_v36  ;;  %v243_v40 = vld [vmem:[#allocation5 + $0xc0] sm:$0xff]  ;;  %v245_v41 = vld [vmem:[#allocation5 + $0xd0] sm:$0xff]  ;;  %v248_v42 = vld [vmem:[#allocation5 + $0xe8] sm:$0xff]  ;;  %p637_p0 = por %p636_p11, %p635_p12 }
  0x64   : > { %v250_v43 = vld [vmem:[#allocation5 + $0xf8] sm:$0xff]  ;;  %v488_v44 = vpack.c.bf16 %v245_v41, %v243_v40  ;;  %v247_v46 = vld [vmem:[#allocation5 + $0xe0] sm:$0xff]  ;;  %v249_v47 = vld [vmem:[#allocation5 + $0xf0] sm:$0xff] }
  0x65   : > { %v490_v45 = vpack.c.bf16 %v250_v43, %v248_v42  ;;  %v492_v48 = vpack.c.bf16 %v249_v47, %v247_v46  ;;  %v218_v49 = vld [vmem:[%s895_s4] sm:$0xff]  ;;  %p638_p5 = pnand %p637_p0, %p631_p8 }
  0x66   : > { %473 = vmatpush1.bf16.msra.mxu0 %v472_v20  ;;  %v251_v53 = vld [vmem:[%s965_s2] sm:$0x3] }
  0x67   : > { %475 = vmatprep.subr.bf16.mxu0 %v474_v21  ;;  %v256_v55 = vrot.slane %v251_v53, %v255_v52  ;;  %v260_v56 = vrot.slane %v251_v53, %v259_v54 }
  0x6a   : > { %477 = vmatpush1.bf16.msra.mxu0 %v476_v26 }
  0x6b   : > { %479 = vmatprep.subr.bf16.mxu0 %v478_v27 }
  0x6e   : > { %481 = vmatpush1.bf16.msra.mxu0 %v480_v32 }
  0x6f   : > { %483 = vmatprep.subr.bf16.mxu0 %v482_v33 }
  0x72   : > { %485 = vmatpush1.bf16.msra.mxu0 %v484_v38 }
  0x73   : > { %487 = vmatprep.subr.bf16.mxu0 %v486_v39 }
  0x76   : > { %489 = vmatpush1.bf16.msra.mxu0 %v488_v44 }
  0x77   : > { %491 = vmatprep.subr.bf16.mxu0 %v490_v45 }
  0x7a   : > { %493 = vmatpush1.bf16.msra.mxu0 %v492_v48 }
  0x7d   : > { %328 = vmatmul.mubr.f32.vlgmr.msra.gmra.mrb[0].mxu0 %v218_v49 }
 0x150   : > { %v329_v57 = vpop.f32.mrb[0].mxu0 }
 0x151   : > { %v330_v58 = vadd.f32 %v329_v57, %v256_v55  ;;  %v331_v59 = vpop.f32.mrb[1].mxu0 }
 0x152   : > { %v332_v60 = vadd.f32 %v331_v59, %v260_v56 }
 0x153   : > { %334 = vst [vmem:[%s217_s10] sm:$0xff] %v330_v58 }
 0x154   : > { %335 = vst [vmem:[%s217_s10 + $0x8] sm:$0xff] %v332_v60 }
 0x155   : > { %641 = shalt.err (!%p638_p5)
}
 0x156   : > { %s642_s19 = scalar_lea.hbm %s914_s6, 256  ;;  %s646_s4 = scalar_lea.hbm %s966_s3, 512 }
 0x157   : > { %p643_p9 = scmp.ne.s32.totalorder %s914_s6, %s642_s19  ;;  %p647_p7 = scmp.lt.u32.totalorder %s914_s6, %s966_s3 }
 0x158   : > { %p648_p3 = scmp.lt.u32.totalorder %s646_s4, %s642_s19  ;;  %p650_p4 = scmp.lt.u32.totalorder %s642_s19, %s914_s6 }
 0x159   : > { %p644_p1 = pnand %p643_p9, %p838_p10 }
 0x15a   : > { %p649_p13 = por %p648_p3, %p647_p7 }
 0x15b   : > { %p645_p2 = pneg %p644_p1 }
 0x15c   : > { %p651_p6 = por %p650_p4, %p649_p13 }
 0x15e   : > { %p652_p8 = pnand %p651_p6, %p645_p2 }
 0x160   : > { %655 = shalt.err (!%p652_p8)
}
 0x161   : > { %500 = dma.vmem_to_hbm [thread:$0]  (%p838_p10), %s916_s11, 256, %s914_s6, %s337_s26  }
 0x162 PF: > { %s365_s24 = sand.u32 1, %s694_s12   ;;  %p984_p12 = scmp.ne.s32.totalorder %s974_s23, 0 }
 0x163   : > { %p985_p11 = scmp.ge.s32.totalorder %s714_s17, 2  ;;  %s366_s9 = scalar_lea.sflag [#allocation4], %s365_s24 }
 0x165   : > { %p511_p0 = pnand %p985_p11, %p984_p12 }
 0x167   : > { %689 = dma.done.wait (!%p511_p0), %s366_s9, 256  }
 0x168   : > { %691 = vsyncadd (!%p511_p0), %s366_s9, 4294967040  ;;  %s20_s17 = sadd.s32 1, %s714_s17   ;;  %s986_s12 = smov %s698_s13 }
 0x169   : > { %p17_p5 = scmp.ge.s32.totalorder %s20_s17, 4   ;;  %s987_s13 = smov %s702_s14 }
 0x16a   : > { %s988_s14 = smov %s847_s5  ;;  %s989_s15 = smov %s710_s16 }
 0x16b   : > { %s990_s16 = smov %s992_s28  ;;  %19 = sbr.rel (!%p17_p5) target bundleno = 7 (0x7), region = 81 }
 0x172   :  { %371 = vsyncpa [#allocation3], 1 }
 0x173   :  { %373 = vsyncpa [#allocation3 + $0x1], 1 }
 0x174   :  { %374 = vsyncpa [#allocation6], 1 }
 0x175   :  { %375 = vsyncpa [#allocation4], 1 }
 0x176   :  { %377 = vsyncpa [#allocation4 + $0x1], 1 }

</bundles_post_ra>
